<compile_context>
chip_gen: v6e
topology: v6e:2x2x1
jax: 0.10.0
libtpu: 0.0.40
codegen_flags: <defaults>
</compile_context>

<pallas_src>
import jax
import jax.numpy as jnp
from jax.experimental import pallas as pl
from jax.experimental.pallas import tpu as pltpu


def _round_up(x, n):
    return ((x + n - 1) // n) * n


def _sublane_for(dtype):
    # f32 -> 8, bf16 -> 16, int8/fp8 -> 32 (sub-32-bit dtypes pack along sublanes).
    itemsize = jnp.dtype(dtype).itemsize
    return 8 * max(1, 4 // max(itemsize, 1))


def _vmem_capacity_bytes():
    try:
        info = pltpu.get_tpu_info()
        cap = getattr(info, "vmem_capacity_bytes", None)
        if cap:
            return int(cap)
    except Exception:
        pass
    return 64 * 1024 * 1024  # conservative (v7x per-TC VMEM)


def _ffn_kernel(x_ref, w1_ref, b1_ref, w2_ref, b2_ref, o_ref, acc_ref):
    # x_ref : (TM, Din_p)         w1_ref: (Din_p, TH)     b1_ref: (1, TH)
    # w2_ref: (TH, Dout_p)        b2_ref: (1, Dout_p)
    # o_ref : (TM, Dout_p)        acc_ref: (TM, Dout_p) f32 scratch
    j = pl.program_id(1)

    @pl.when(j == 0)
    def _():
        acc_ref[...] = jnp.zeros_like(acc_ref)

    # fc1 partial (full Din contraction, hidden columns [j*TH, (j+1)*TH)).
    # MXU operands in the weight dtype (bf16 by default), f32 accumulation.
    x = x_ref[...].astype(w1_ref.dtype)
    h = jnp.dot(x, w1_ref[...], preferred_element_type=jnp.float32)
    # bias + ReLU in f32 on the VPU.
    h = jnp.maximum(h + b1_ref[...].astype(jnp.float32), 0.0)
    # dropout: identity (eval-mode forward).
    # fc2 partial: accumulate this hidden slab's contribution in f32.
    acc_ref[...] += jnp.dot(h.astype(w2_ref.dtype), w2_ref[...],
                            preferred_element_type=jnp.float32)

    @pl.when(j == pl.num_programs(1) - 1)
    def _():
        out = acc_ref[...] + b2_ref[...].astype(jnp.float32)
        o_ref[...] = out.astype(o_ref.dtype)


def prepare_params(w1, b1, w2, b2, *, compute_dtype=jnp.bfloat16):
    """Pad (feature dims -> multiples of 128) and cast the parameters ONCE.

    Doing this outside the per-call path removes the per-call HBM->HBM weight
    padding copies.  Weights are stored in `compute_dtype` (bf16 by default so
    the MXU runs at bf16 throughput and weight DMA/VMEM bytes are halved);
    biases stay f32 (added on the VPU in f32).
    """
    din, hid = w1.shape
    dout = w2.shape[1]
    b1 = jnp.asarray(b1).reshape(1, hid)
    b2 = jnp.asarray(b2).reshape(1, dout)

    din_p = _round_up(din, 128)
    hid_p = _round_up(hid, 128)
    dout_p = _round_up(dout, 128)

    # Zero padding is semantically safe: padded x cols contribute 0, padded
    # hidden cols are relu(0 + 0) = 0 and hit zero rows of w2, padded output
    # cols (bias pad = 0) are sliced off in the wrapper.
    w1_p = jnp.zeros((din_p, hid_p), compute_dtype).at[:din, :hid].set(
        w1.astype(compute_dtype))
    w2_p = jnp.zeros((hid_p, dout_p), compute_dtype).at[:hid, :dout].set(
        w2.astype(compute_dtype))
    b1_p = jnp.zeros((1, hid_p), jnp.float32).at[:, :hid].set(b1.astype(jnp.float32))
    b2_p = jnp.zeros((1, dout_p), jnp.float32).at[:, :dout].set(b2.astype(jnp.float32))

    return dict(w1=w1_p, b1=b1_p, w2=w2_p, b2=b2_p,
                din=din, hid=hid, dout=dout,
                din_p=din_p, hid_p=hid_p, dout_p=dout_p)


def feed_forward_block(x, params, *, tm_max=1024):
    """x: [..., input_dim] -> [..., output_dim]; fused fc1 -> ReLU -> fc2 kernel."""
    din, dout = params["din"], params["dout"]
    din_p, hid_p, dout_p = params["din_p"], params["hid_p"], params["dout_p"]
    w1_p, b1_p, w2_p, b2_p = params["w1"], params["b1"], params["w2"], params["b2"]

    orig_shape = x.shape
    assert orig_shape[-1] == din, "last dim of x must equal input_dim"
    x2d = x.reshape(-1, din)
    m = x2d.shape[0]

    # Fast path: no x copy when Din is already lane-aligned.
    if din == din_p:
        x_in = x2d
    else:
        x_in = jnp.zeros((m, din_p), x.dtype).at[:, :din].set(x2d)

    x_bytes = jnp.dtype(x_in.dtype).itemsize
    w_bytes = jnp.dtype(w1_p.dtype).itemsize
    sublane = _sublane_for(x_in.dtype)

    # ---- VMEM budget (generation aware) ------------------------------------
    cap = _vmem_capacity_bytes()                 # 128 MiB v5e/v6e, 64 MiB v7x
    vmem_limit = cap * 3 // 4                    # ~96 MiB / ~48 MiB
    budget = int(vmem_limit * 0.85)              # headroom for compiler temps

    # ---- hidden tile: keep per-step weight blocks within half the budget ----
    th = hid_p
    while th > 128 and th % 256 == 0 and (din_p + dout_p) * th * w_bytes > budget // 2:
        th //= 2
    n_h = hid_p // th

    # ---- row tile: fill the remaining budget, dtype-aware sublane rounding --
    weight_buf = 1 if n_h == 1 else 2
    fixed = weight_buf * (din_p * th + th * dout_p) * w_bytes \
        + 2 * (th + dout_p) * 4                              # biases (tiny)
    per_row = (2 * din_p * x_bytes        # double-buffered x tile
               + 2 * dout_p * x_bytes     # double-buffered out tile
               + dout_p * 4               # f32 accumulator scratch
               + th * 4 + th * w_bytes)   # f32 fc1 intermediate (+ cast copy)
    avail = max(budget - fixed, per_row * sublane)
    tm = min(tm_max, avail // per_row, _round_up(m, sublane))
    tm = max(sublane, (tm // sublane) * sublane)

    # Ensure >= 2 row tiles so the "parallel" axis actually shards across
    # v7x's two TensorCores (one negligible extra grid step on 1-TC chips).
    if m > sublane and pl.cdiv(m, tm) < 2:
        tm = _round_up(pl.cdiv(m, 2), sublane)
    n_rows = pl.cdiv(m, tm)

    # ---- cost hint for XLA's scheduler --------------------------------------
    cost = pl.CostEstimate(
        flops=2 * m * (din_p * hid_p + hid_p * dout_p),
        transcendentals=0,
        bytes_accessed=(m * din_p * x_bytes + m * dout_p * x_bytes
                        + (din_p * hid_p + hid_p * dout_p) * w_bytes
                        + (hid_p + dout_p) * 4),
    )

    def build(single_buffer_weights):
        if single_buffer_weights:
            # Resident operands (constant index_map) don't need double buffering;
            # halving their VMEM footprint matters most on v7x (64 MiB/TC).
            w_mode = dict(pipeline_mode=pl.Buffered(buffer_count=1))
        else:
            w_mode = {}
        return pl.pallas_call(
            _ffn_kernel,
            out_shape=jax.ShapeDtypeStruct((m, dout_p), x.dtype),
            grid=(n_rows, n_h),
            in_specs=[
                pl.BlockSpec((tm, din_p), lambda i, j: (i, 0)),
                pl.BlockSpec((din_p, th), lambda i, j: (0, j), **w_mode),
                pl.BlockSpec((1, th), lambda i, j: (0, j), **w_mode),
                pl.BlockSpec((th, dout_p), lambda i, j: (j, 0), **w_mode),
                pl.BlockSpec((1, dout_p), lambda i, j: (0, 0), **w_mode),
            ],
            out_specs=pl.BlockSpec((tm, dout_p), lambda i, j: (i, 0)),
            scratch_shapes=[pltpu.VMEM((tm, dout_p), jnp.float32)],
            compiler_params=pltpu.CompilerParams(
                dimension_semantics=("parallel", "arbitrary"),
                vmem_limit_bytes=int(vmem_limit),
            ),
            cost_estimate=cost,
        )

    single_buffer = (n_h == 1)
    try:
        out_p = build(single_buffer)(x_in, w1_p, b1_p, w2_p, b2_p)
    except Exception:
        if not single_buffer:
            raise
        # Fallback if this JAX version rejects single-buffered block specs.
        out_p = build(False)(x_in, w1_p, b1_p, w2_p, b2_p)

    out2d = out_p if dout == dout_p else out_p[:, :dout]
    return out2d.reshape(orig_shape[:-1] + (dout,))


def init_params(key, input_dim, hidden_dim, output_dim, dtype=jnp.float32):
    """Deterministic PyTorch-style Linear init: U(-1/sqrt(fan_in), 1/sqrt(fan_in))."""
    k1, k2, k3, k4 = jax.random.split(key, 4)
    bound1 = 1.0 / (input_dim ** 0.5)
    bound2 = 1.0 / (hidden_dim ** 0.5)
    w1 = jax.random.uniform(k1, (input_dim, hidden_dim), dtype, -bound1, bound1)
    b1 = jax.random.uniform(k2, (1, hidden_dim), dtype, -bound1, bound1)
    w2 = jax.random.uniform(k3, (hidden_dim, output_dim), dtype, -bound2, bound2)
    b2 = jax.random.uniform(k4, (1, output_dim), dtype, -bound2, bound2)
    return w1, b1, w2, b2


def _ref(x, w1, b1, w2, b2):
    # Pure-JAX reference (eval-mode dropout = identity), full-precision matmuls.
    hp = jax.lax.Precision.HIGHEST
    h = jnp.maximum(jnp.matmul(x, w1, precision=hp) + b1[0], 0.0)
    return jnp.matmul(h, w2, precision=hp) + b2[0]


if __name__ == "__main__":
    key = jax.random.PRNGKey(0)
    kx1, kp1, kx2, kp2 = jax.random.split(key, 4)

    # Case 1: lane-aligned feature dims (fast path, no x copy), bf16 MXU operands.
    batch, seq, input_dim, hidden_dim, output_dim = 2, 8, 128, 256, 128
    x = jax.random.normal(kx1, (batch, seq, input_dim), dtype=jnp.float32)
    w1, b1, w2, b2 = init_params(kp1, input_dim, hidden_dim, output_dim)

    params_bf16 = prepare_params(w1, b1, w2, b2, compute_dtype=jnp.bfloat16)
    out = jax.block_until_ready(feed_forward_block(x, params_bf16))
    assert out.shape == (batch, seq, output_dim)
    assert jnp.allclose(out, _ref(x, w1, b1, w2, b2), atol=5e-2, rtol=5e-2)

    # Same case with f32 MXU operands: tight numerical check of the kernel path.
    params_f32 = prepare_params(w1, b1, w2, b2, compute_dtype=jnp.float32)
    out_f32 = jax.block_until_ready(feed_forward_block(x, params_f32))
    assert jnp.allclose(out_f32, _ref(x, w1, b1, w2, b2), atol=1e-4, rtol=1e-4)

    # Case 2: unaligned feature dims + ragged row count (padding path, masked
    # boundary stores, >=2 row tiles).
    b2_, s2, din2, hid2, dout2 = 3, 5, 32, 64, 24
    x2 = jax.random.normal(kx2, (b2_, s2, din2), dtype=jnp.float32)
    w1b, b1b, w2b, b2b = init_params(kp2, din2, hid2, dout2)
    p2 = prepare_params(w1b, b1b, w2b, b2b, compute_dtype=jnp.float32)
    out2 = jax.block_until_ready(feed_forward_block(x2, p2))
    assert out2.shape == (b2_, s2, dout2)
    assert jnp.allclose(out2, _ref(x2, w1b, b1b, w2b, b2b), atol=1e-4, rtol=1e-4)

    print("KERNEL_OK")
</pallas_src>

<mosaic_0001>
module attributes {stable_mosaic.version = 11 : i64} {
  func.func @_ffn_kernel(%arg0: i32, %arg1: i32, %arg2: memref<8x128xf32, #tpu.memory_space<vmem>>, %arg3: memref<128x256xbf16, #tpu.memory_space<vmem>>, %arg4: memref<1x256xf32, #tpu.memory_space<vmem>>, %arg5: memref<256x128xbf16, #tpu.memory_space<vmem>>, %arg6: memref<1x128xf32, #tpu.memory_space<vmem>>, %arg7: memref<8x128xf32, #tpu.memory_space<vmem>>, %arg8: memref<8x128xf32, #tpu.memory_space<vmem>>) attributes {dimension_semantics = [#tpu.dimension_semantics<parallel>, #tpu.dimension_semantics<arbitrary>], iteration_bounds = array<i64: 2, 1>, scalar_prefetch = 0 : i64, scratch_operands = 1 : i64, tpu.core_type = #tpu.core_type<tc>, window_params = [{transform_indices = @transform_0, window_bounds = array<i64: 8, 128>}, {pipeline_mode = #tpu.pipeline_mode<synchronous>, transform_indices = @transform_1, window_bounds = array<i64: 128, 256>}, {pipeline_mode = #tpu.pipeline_mode<synchronous>, transform_indices = @transform_2, window_bounds = array<i64: 1, 256>}, {pipeline_mode = #tpu.pipeline_mode<synchronous>, transform_indices = @transform_3, window_bounds = array<i64: 256, 128>}, {pipeline_mode = #tpu.pipeline_mode<synchronous>, transform_indices = @transform_4, window_bounds = array<i64: 1, 128>}, {transform_indices = @transform_5, window_bounds = array<i64: 8, 128>}]} {
    %c0_i32 = arith.constant 0 : i32
    %0 = arith.cmpi eq, %arg1, %c0_i32 : i32
    %1 = arith.extui %0 : i1 to i32
    %c0_i32_0 = arith.constant 0 : i32
    %2 = arith.cmpi ne, %1, %c0_i32_0 : i32
    scf.if %2 {
      %cst_16 = arith.constant 0.000000e+00 : f32
      %21 = vector.broadcast %cst_16 : f32 to vector<8x128xf32>
      %c0_17 = arith.constant 0 : index
      %c0_18 = arith.constant 0 : index
      %22 = vector.load %arg8[%c0_17, %c0_18] : memref<8x128xf32, #tpu.memory_space<vmem>>, vector<8x128xf32>
      tpu.vector_store %arg8[%c0_17, %c0_18], %21 {strides = array<i32>} : memref<8x128xf32, #tpu.memory_space<vmem>>, vector<8x128xf32>,
    } else {
    }
    %c0 = arith.constant 0 : index
    %c0_1 = arith.constant 0 : index
    %3 = vector.load %arg2[%c0, %c0_1] : memref<8x128xf32, #tpu.memory_space<vmem>>, vector<8x128xf32>
    %4 = arith.truncf %3 : vector<8x128xf32> to vector<8x128xbf16>
    %c0_2 = arith.constant 0 : index
    %c0_3 = arith.constant 0 : index
    %5 = vector.load %arg3[%c0_2, %c0_3] : memref<128x256xbf16, #tpu.memory_space<vmem>>, vector<128x256xbf16>
    %cst = arith.constant dense<0.000000e+00> : vector<8x256xf32>
    %6 = tpu.matmul %4, %5, %cst {dimension_numbers = #tpu.dot_dimension_numbers<[1], [0], [0], [1], [0, 0, 1, 1], [], []>} : vector<8x128xbf16>, vector<128x256xbf16>, vector<8x256xf32> -> vector<8x256xf32>
    %c0_4 = arith.constant 0 : index
    %c0_5 = arith.constant 0 : index
    %7 = vector.load %arg4[%c0_4, %c0_5] : memref<1x256xf32, #tpu.memory_space<vmem>>, vector<1x256xf32>
    %8 = vector.broadcast %7 : vector<1x256xf32> to vector<8x256xf32>
    %9 = arith.addf %6, %8 : vector<8x256xf32>
    %cst_6 = arith.constant 0.000000e+00 : f32
    %10 = vector.broadcast %cst_6 : f32 to vector<8x256xf32>
    %11 = arith.maximumf %9, %10 : vector<8x256xf32>
    %c0_7 = arith.constant 0 : index
    %c0_8 = arith.constant 0 : index
    %12 = vector.load %arg8[%c0_7, %c0_8] : memref<8x128xf32, #tpu.memory_space<vmem>>, vector<8x128xf32>
    %13 = arith.truncf %11 : vector<8x256xf32> to vector<8x256xbf16>
    %c0_9 = arith.constant 0 : index
    %c0_10 = arith.constant 0 : index
    %14 = vector.load %arg5[%c0_9, %c0_10] : memref<256x128xbf16, #tpu.memory_space<vmem>>, vector<256x128xbf16>
    %cst_11 = arith.constant dense<0.000000e+00> : vector<8x128xf32>
    %15 = tpu.matmul %13, %14, %cst_11 {dimension_numbers = #tpu.dot_dimension_numbers<[1], [0], [0], [1], [0, 0, 1, 1], [], []>} : vector<8x256xbf16>, vector<256x128xbf16>, vector<8x128xf32> -> vector<8x128xf32>
    %16 = arith.addf %12, %15 : vector<8x128xf32>
    %c0_12 = arith.constant 0 : index
    %c0_13 = arith.constant 0 : index
    %17 = vector.load %arg8[%c0_12, %c0_13] : memref<8x128xf32, #tpu.memory_space<vmem>>, vector<8x128xf32>
    tpu.vector_store %arg8[%c0_12, %c0_13], %16 {strides = array<i32>} : memref<8x128xf32, #tpu.memory_space<vmem>>, vector<8x128xf32>,
    %c0_i32_14 = arith.constant 0 : i32
    %18 = arith.cmpi eq, %arg1, %c0_i32_14 : i32
    %19 = arith.extui %18 : i1 to i32
    %c0_i32_15 = arith.constant 0 : i32
    %20 = arith.cmpi ne, %19, %c0_i32_15 : i32
    scf.if %20 {
      %c0_16 = arith.constant 0 : index
      %c0_17 = arith.constant 0 : index
      %21 = vector.load %arg8[%c0_16, %c0_17] : memref<8x128xf32, #tpu.memory_space<vmem>>, vector<8x128xf32>
      %c0_18 = arith.constant 0 : index
      %c0_19 = arith.constant 0 : index
      %22 = vector.load %arg6[%c0_18, %c0_19] : memref<1x128xf32, #tpu.memory_space<vmem>>, vector<1x128xf32>
      %23 = vector.broadcast %22 : vector<1x128xf32> to vector<8x128xf32>
      %24 = arith.addf %21, %23 : vector<8x128xf32>
      %c0_20 = arith.constant 0 : index
      %c0_21 = arith.constant 0 : index
      %25 = vector.load %arg7[%c0_20, %c0_21] : memref<8x128xf32, #tpu.memory_space<vmem>>, vector<8x128xf32>
      tpu.vector_store %arg7[%c0_20, %c0_21], %24 {strides = array<i32>} : memref<8x128xf32, #tpu.memory_space<vmem>>, vector<8x128xf32>,
    } else {
    }
    return
  }
  func.func @transform_0(%arg0: i32, %arg1: i32) -> (i32, i32) {
    %c0_i32 = arith.constant 0 : i32
    %c0_i32_0 = arith.constant 0 : i32
    return %arg0, %c0_i32 : i32, i32
  }
  func.func @transform_1(%arg0: i32, %arg1: i32) -> (i32, i32) {
    %c0_i32 = arith.constant 0 : i32
    %c0_i32_0 = arith.constant 0 : i32
    return %c0_i32, %arg1 : i32, i32
  }
  func.func @transform_2(%arg0: i32, %arg1: i32) -> (i32, i32) {
    %c0_i32 = arith.constant 0 : i32
    %c0_i32_0 = arith.constant 0 : i32
    return %c0_i32, %arg1 : i32, i32
  }
  func.func @transform_3(%arg0: i32, %arg1: i32) -> (i32, i32) {
    %c0_i32 = arith.constant 0 : i32
    %c0_i32_0 = arith.constant 0 : i32
    return %arg1, %c0_i32 : i32, i32
  }
  func.func @transform_4(%arg0: i32, %arg1: i32) -> (i32, i32) {
    %c0_i32 = arith.constant 0 : i32
    %c0_i32_0 = arith.constant 0 : i32
    %c0_i32_1 = arith.constant 0 : i32
    return %c0_i32, %c0_i32_0 : i32, i32
  }
  func.func @transform_5(%arg0: i32, %arg1: i32) -> (i32, i32) {
    %c0_i32 = arith.constant 0 : i32
    %c0_i32_0 = arith.constant 0 : i32
    return %arg0, %c0_i32 : i32, i32
  }
}

module attributes {stable_mosaic.version = 11 : i64} {
  func.func @_ffn_kernel(%arg0: i32, %arg1: i32, %arg2: memref<8x128xf32, #tpu.memory_space<vmem>>, %arg3: memref<128x256xbf16, #tpu.memory_space<vmem>>, %arg4: memref<1x256xf32, #tpu.memory_space<vmem>>, %arg5: memref<256x128xbf16, #tpu.memory_space<vmem>>, %arg6: memref<1x128xf32, #tpu.memory_space<vmem>>, %arg7: memref<8x128xf32, #tpu.memory_space<vmem>>, %arg8: memref<8x128xf32, #tpu.memory_space<vmem>>) attributes {dimension_semantics = [#tpu.dimension_semantics<parallel>, #tpu.dimension_semantics<arbitrary>], iteration_bounds = array<i64: 2, 1>, scalar_prefetch = 0 : i64, scratch_operands = 1 : i64, tpu.core_type = #tpu.core_type<tc>, window_params = [{transform_indices = @transform_0, window_bounds = array<i64: 8, 128>}, {transform_indices = @transform_1, window_bounds = array<i64: 128, 256>}, {transform_indices = @transform_2, window_bounds = array<i64: 1, 256>}, {transform_indices = @transform_3, window_bounds = array<i64: 256, 128>}, {pipeline_mode = #tpu.pipeline_mode<synchronous>, transform_indices = @transform_4, window_bounds = array<i64: 1, 128>}, {transform_indices = @transform_5, window_bounds = array<i64: 8, 128>}]} {
    %c0_i32 = arith.constant 0 : i32
    %0 = arith.cmpi eq, %arg1, %c0_i32 : i32
    %1 = arith.extui %0 : i1 to i32
    %c0_i32_0 = arith.constant 0 : i32
    %2 = arith.cmpi ne, %1, %c0_i32_0 : i32
    scf.if %2 {
      %cst_16 = arith.constant 0.000000e+00 : f32
      %21 = vector.broadcast %cst_16 : f32 to vector<8x128xf32>
      %c0_17 = arith.constant 0 : index
      %c0_18 = arith.constant 0 : index
      %22 = vector.load %arg8[%c0_17, %c0_18] : memref<8x128xf32, #tpu.memory_space<vmem>>, vector<8x128xf32>
      tpu.vector_store %arg8[%c0_17, %c0_18], %21 {strides = array<i32>} : memref<8x128xf32, #tpu.memory_space<vmem>>, vector<8x128xf32>,
    } else {
    }
    %c0 = arith.constant 0 : index
    %c0_1 = arith.constant 0 : index
    %3 = vector.load %arg2[%c0, %c0_1] : memref<8x128xf32, #tpu.memory_space<vmem>>, vector<8x128xf32>
    %4 = arith.truncf %3 : vector<8x128xf32> to vector<8x128xbf16>
    %c0_2 = arith.constant 0 : index
    %c0_3 = arith.constant 0 : index
    %5 = vector.load %arg3[%c0_2, %c0_3] : memref<128x256xbf16, #tpu.memory_space<vmem>>, vector<128x256xbf16>
    %cst = arith.constant dense<0.000000e+00> : vector<8x256xf32>
    %6 = tpu.matmul %4, %5, %cst {dimension_numbers = #tpu.dot_dimension_numbers<[1], [0], [0], [1], [0, 0, 1, 1], [], []>} : vector<8x128xbf16>, vector<128x256xbf16>, vector<8x256xf32> -> vector<8x256xf32>
    %c0_4 = arith.constant 0 : index
    %c0_5 = arith.constant 0 : index
    %7 = vector.load %arg4[%c0_4, %c0_5] : memref<1x256xf32, #tpu.memory_space<vmem>>, vector<1x256xf32>
    %8 = vector.broadcast %7 : vector<1x256xf32> to vector<8x256xf32>
    %9 = arith.addf %6, %8 : vector<8x256xf32>
    %cst_6 = arith.constant 0.000000e+00 : f32
    %10 = vector.broadcast %cst_6 : f32 to vector<8x256xf32>
    %11 = arith.maximumf %9, %10 : vector<8x256xf32>
    %c0_7 = arith.constant 0 : index
    %c0_8 = arith.constant 0 : index
    %12 = vector.load %arg8[%c0_7, %c0_8] : memref<8x128xf32, #tpu.memory_space<vmem>>, vector<8x128xf32>
    %13 = arith.truncf %11 : vector<8x256xf32> to vector<8x256xbf16>
    %c0_9 = arith.constant 0 : index
    %c0_10 = arith.constant 0 : index
    %14 = vector.load %arg5[%c0_9, %c0_10] : memref<256x128xbf16, #tpu.memory_space<vmem>>, vector<256x128xbf16>
    %cst_11 = arith.constant dense<0.000000e+00> : vector<8x128xf32>
    %15 = tpu.matmul %13, %14, %cst_11 {dimension_numbers = #tpu.dot_dimension_numbers<[1], [0], [0], [1], [0, 0, 1, 1], [], []>} : vector<8x256xbf16>, vector<256x128xbf16>, vector<8x128xf32> -> vector<8x128xf32>
    %16 = arith.addf %12, %15 : vector<8x128xf32>
    %c0_12 = arith.constant 0 : index
    %c0_13 = arith.constant 0 : index
    %17 = vector.load %arg8[%c0_12, %c0_13] : memref<8x128xf32, #tpu.memory_space<vmem>>, vector<8x128xf32>
    tpu.vector_store %arg8[%c0_12, %c0_13], %16 {strides = array<i32>} : memref<8x128xf32, #tpu.memory_space<vmem>>, vector<8x128xf32>,
    %c0_i32_14 = arith.constant 0 : i32
    %18 = arith.cmpi eq, %arg1, %c0_i32_14 : i32
    %19 = arith.extui %18 : i1 to i32
    %c0_i32_15 = arith.constant 0 : i32
    %20 = arith.cmpi ne, %19, %c0_i32_15 : i32
    scf.if %20 {
      %c0_16 = arith.constant 0 : index
      %c0_17 = arith.constant 0 : index
      %21 = vector.load %arg8[%c0_16, %c0_17] : memref<8x128xf32, #tpu.memory_space<vmem>>, vector<8x128xf32>
      %c0_18 = arith.constant 0 : index
      %c0_19 = arith.constant 0 : index
      %22 = vector.load %arg6[%c0_18, %c0_19] : memref<1x128xf32, #tpu.memory_space<vmem>>, vector<1x128xf32>
      %23 = vector.broadcast %22 : vector<1x128xf32> to vector<8x128xf32>
      %24 = arith.addf %21, %23 : vector<8x128xf32>
      %c0_20 = arith.constant 0 : index
      %c0_21 = arith.constant 0 : index
      %25 = vector.load %arg7[%c0_20, %c0_21] : memref<8x128xf32, #tpu.memory_space<vmem>>, vector<8x128xf32>
      tpu.vector_store %arg7[%c0_20, %c0_21], %24 {strides = array<i32>} : memref<8x128xf32, #tpu.memory_space<vmem>>, vector<8x128xf32>,
    } else {
    }
    return
  }
  func.func @transform_0(%arg0: i32, %arg1: i32) -> (i32, i32) {
    %c0_i32 = arith.constant 0 : i32
    %c0_i32_0 = arith.constant 0 : i32
    return %arg0, %c0_i32 : i32, i32
  }
  func.func @transform_1(%arg0: i32, %arg1: i32) -> (i32, i32) {
    %c0_i32 = arith.constant 0 : i32
    %c0_i32_0 = arith.constant 0 : i32
    return %c0_i32, %arg1 : i32, i32
  }
  func.func @transform_2(%arg0: i32, %arg1: i32) -> (i32, i32) {
    %c0_i32 = arith.constant 0 : i32
    %c0_i32_0 = arith.constant 0 : i32
    return %c0_i32, %arg1 : i32, i32
  }
  func.func @transform_3(%arg0: i32, %arg1: i32) -> (i32, i32) {
    %c0_i32 = arith.constant 0 : i32
    %c0_i32_0 = arith.constant 0 : i32
    return %arg1, %c0_i32 : i32, i32
  }
  func.func @transform_4(%arg0: i32, %arg1: i32) -> (i32, i32) {
    %c0_i32 = arith.constant 0 : i32
    %c0_i32_0 = arith.constant 0 : i32
    %c0_i32_1 = arith.constant 0 : i32
    return %c0_i32, %c0_i32_0 : i32, i32
  }
  func.func @transform_5(%arg0: i32, %arg1: i32) -> (i32, i32) {
    %c0_i32 = arith.constant 0 : i32
    %c0_i32_0 = arith.constant 0 : i32
    return %arg0, %c0_i32 : i32, i32
  }
}

</mosaic_0001>

<bundles_post_ra>
// kernel: tpu_custom_call.1
= control target key start
LH: loop header
LB: loop body
LE: loop exit
PB: predicated region body
PF: predicated region fallthrough
CT: control target
= control target key end

     0   :  { %s1389_s0 = inlined_call_operand.hbm [shape: f32[16,128], index: 0, kind: input, shape index: {}]   ;;  %s1390_s1 = inlined_call_operand.hbm [shape: bf16[128,256], index: 1, kind: input, shape index: {}]   ;;  %s1391_s2 = inlined_call_operand.vmem [shape: f32[1,256], index: 2, kind: input, shape index: {}]   ;;  %s1392_s3 = inlined_call_operand.hbm [shape: bf16[256,128], index: 3, kind: input, shape index: {}]   ;;  %s1393_s4 = inlined_call_operand.vmem [shape: f32[1,128], index: 4, kind: input, shape index: {}]   ;;  %s1394_s5 = inlined_call_operand.hbm [shape: f32[16,128], index: 5, kind: output, shape index: {}]  }
   0x1   :  { %1398 = sst [smem:[#allocation13_spill]] %s1390_s1 }
   0x2   :  { %10 = vsyncpa [#allocation4], 0 }
   0x3   :  { %12 = vsyncpa [#allocation4 + $0x1], 0 }
   0x4   :  { %13 = vsyncpa [#allocation7], 0 }
   0x5   :  { %14 = vsyncpa [#allocation5], 0 }
   0x6   :  { %16 = vsyncpa [#allocation5 + $0x1], 0  ;;  %s1196_s18 = smov 0   ;;  %s1198_s19 = smov 0  }
   0x7   :  { %s1200_s20 = smov 0   ;;  %s1202_s21 = smov 0  }
   0x8   :  { %s1204_s22 = smov 0   ;;  %s1206_s23 = smov 0  }
   0x9 LB: > { %s790_s24 = sadd.s32 4294967295, %s1155_s23   ;;  %s791_s25 = sadd.s32 4294967294, %s1155_s23   ;;  %s1155_s23 = sphi %s1206_s23, %s22_s23   ;;  %s1151_s22 = sphi %s1204_s22, %s1416_s22   ;;  %s1147_s21 = sphi %s1202_s21, %s1415_s21   ;;  %s1143_s20 = sphi %s1200_s20, %s1414_s20   ;;  %s1139_s19 = sphi %s1198_s19, %s1413_s19   ;;  %s1135_s18 = sphi %s1196_s18, %s1412_s18  }
   0xa   : > { %p54_p0 = scmp.ne.s32.totalorder %s1139_s19, %s1135_s18  ;;  %p1230_p1 = scmp.eq.s32.totalorder %s790_s24, 0 }
   0xb   : > { %p1234_p2 = scmp.eq.s32.totalorder %s790_s24, 1  ;;  %p183_p3 = scmp.eq.s32.totalorder %s791_s25, 1 }
   0xc   : > { %s1399_s26 = scalar_select %p1230_p1, 1, 0 }
   0xd   : > { %p1240_p4 = por %p1230_p1, %p54_p0  ;;  %p792_p5 = scmp.ge.s32.totalorder %s1155_s23, 1 }
   0xe   : > { %p1245_p6 = por %p183_p3, %p54_p0  ;;  %p190_p7 = scmp.lt.s32.totalorder %s1155_s23, 3 }
   0xf   : > { %s1401_s28 = scalar_select %p1240_p4, 1, 0 }
  0x10   : > { %s1402_s29 = scalar_select %p1245_p6, 1, 0 }
  0x11   : > { %p1250_p8 = pnand %p792_p5, %p190_p7  ;;  %s1157_s6 = smov [#allocation6]  }
  0x12   : > { %s205_s7 = sshll.u32 %s1157_s6, 4  ;;  %s1158_s9 = smov [#allocation8]   ;;  %s206_s7 = int_to_ptr.vmem [resolvable:$true] %s205_s7 }
  0x13   : > { %p875_p9 = pneg %p1250_p8  ;;  %s229_s10 = sshll.u32 %s1158_s9, 4  ;;  %s230_s10 = int_to_ptr.vmem [resolvable:$true] %s229_s10 }
  0x14   : > { %s1002_s11 = scalar_lea.vmem %s206_s7, 2048  ;;  %p1010_p5 = scmp.lt.s32.totalorder %s206_s7, %s206_s7 }
  0x15   : > { %p1259_p11 = pnand %p875_p9, %p1230_p1  ;;  %p1003_p13 = scmp.ne.s32.totalorder %s206_s7, %s1002_s11 }
  0x16   : > { %p1011_p7 = scmp.lt.s32.totalorder %s1002_s11, %s1002_s11 }
  0x17   : > { %p993_p12 = pneg %p1259_p11 }
  0x18   : > { %p1012_p10 = por %p1011_p7, %p1010_p5 }
  0x19   : > { %p1005_p0 = pnand %p1003_p13, %p993_p12 }
  0x1b   : > { %p1006_p3 = pneg %p1005_p0 }
  0x1d   : > { %p1013_p9 = pnand %p1012_p10, %p1006_p3 }
  0x1f   : > { %1016 = shalt.err (!%p1013_p9)
}
  0x20   : > { %s1159_s12 = smov 128   ;;  %s1160_s13 = smov 8  }
  0x21   : > { %s1405_s1 = sld [smem:[#allocation13_spill]]  ;;  %s1028_s16 = scalar_lea.vmem %s230_s10, 2048 }
  0x22   : > { %p1029_p6 = scmp.ne.s32.totalorder %s230_s10, %s1028_s16  ;;  %p1036_p1 = scmp.lt.s32.totalorder %s230_s10, %s230_s10 }
  0x23   : > { %p1037_p4 = scmp.lt.s32.totalorder %s1028_s16, %s1028_s16 }
  0x24   : > { %p1031_p13 = pnand %p1029_p6, %p993_p12 }
  0x25   : > { %p1038_p5 = por %p1037_p4, %p1036_p1 }
  0x26   : > { %p1032_p0 = pneg %p1031_p13 }
  0x27   : > { %878 = dma.hbm_to_vmem [thread:$0]  (!%p1259_p11), %s1405_s1, 2048, %s206_s7, [#allocation7], %s1159_s12, %s1159_s12, %s1160_s13  }
  0x28   : > { %p1039_p10 = pnand %p1038_p5, %p1032_p0 }
  0x2a   : > { %1042 = shalt.err (!%p1039_p10)
}
  0x2b   : > { %s1161_s17 = smov 64   ;;  %s1162_s24 = smov 4  }
  0x2c   : > { %881 = dma.hbm_to_vmem [thread:$0]  (!%p1259_p11), %s1392_s3, 2048, %s230_s10, [#allocation7], %s1161_s17, %s1161_s17, %s1162_s24  }
  0x2d   : > { %s34_s7 = sadd.s32 1, %s1151_s22  ;;  %s41_s9 = sadd.s32 1, %s1143_s20 }
  0x2e   : > { %p36_p1 = scmp.ge.s32.totalorder %s34_s7, 2  ;;  %p48_p4 = scmp.ne.s32.totalorder %s1143_s20, %s1139_s19 }
  0x2f   : > { %p49_p6 = scmp.eq.s32.totalorder %s1155_s23, 0  ;;  %p892_p12 = scmp.lt.s32.totalorder %s1155_s23, 2 }
  0x30   : > { %s1418_s7 = smov (%p36_p1, %s34_s7), 0  ;;  %p1291_p7 = por %p1234_p2, %p48_p4 }
  0x31   : > { %p50_p3 = por %p49_p6, %p48_p4  ;;  %s38_s8 = ssub.s32 %s1151_s22, %s1418_s7 }
  0x32   : > { %s246_s12 = sand.u32 1, %s1143_s20   ;;  %p39_p9 = scmp.eq.s32.totalorder %s38_s8, 0 }
  0x33   : > { %s797_s10 = sshll.u32 %s246_s12, 3  ;;  %s798_s13 = sshll.u32 %s1151_s22, 7 }
  0x34   : > { %s1300_s14 = scalar_select %p39_p9, %s1143_s20, %s41_s9  }
  0x35   : > { %s255_s17 = scalar_lea.hbm %s1389_s0, %s798_s13  ;;  %s250_s24 = scalar_lea.vmem [#allocation3], %s797_s10 }
  0x36   : > { %s257_s25 = sshll.u32 %s250_s24, 4  ;;  %p1307_p11 = pnand %p892_p12, %p50_p3  ;;  %s258_s25 = int_to_ptr.vmem [resolvable:$true] %s257_s25 }
  0x37   : > { %s247_s6 = scalar_lea.sflag [#allocation4], %s246_s12  ;;  %s1056_s8 = scalar_lea.vmem %s258_s25, 128 }
  0x38   : > { %p1045_p2 = pneg %p1307_p11  ;;  %p1057_p13 = scmp.ne.s32.totalorder %s258_s25, %s1056_s8 }
  0x39   : > { %s1163_s9 = smov [#allocation3]  }
  0x3a   : > { %p1059_p0 = pnand %p1057_p13, %p1045_p2  ;;  %s1061_s1 = sshll.u32 %s1163_s9, 4  ;;  %s1062_s1 = int_to_ptr.vmem [resolvable:$false] %s1061_s1 }
  0x3b   : > { %s1063_s13 = scalar_lea.vmem %s1062_s1, 256  ;;  %p1064_p10 = scmp.lt.s32.totalorder %s258_s25, %s1062_s1 }
  0x3c   : > { %p1060_p5 = pneg %p1059_p0  ;;  %p1065_p1 = scmp.lt.s32.totalorder %s1063_s13, %s1056_s8 }
  0x3e   : > { %p1066_p4 = por %p1065_p1, %p1064_p10 }
  0x40   : > { %p1067_p6 = pnand %p1066_p4, %p1060_p5 }
  0x42   : > { %1070 = shalt.err (!%p1067_p6)
}
  0x43   : > { %885 = dma.hbm_to_vmem [thread:$0]  (!%p1307_p11), %s255_s17, 128, %s258_s25, %s247_s6  }
  0x44   : > { %266 = sbr.rel (%p1250_p8) target bundleno = 524 (0x20c), region = 40  ;;  %s1318_s12 = sand.u32 (!%p1250_p8), 1, %s1139_s19  }
  0x45   : > { %s800_s10 = sshll.u32 (!%p1250_p8), %s1318_s12, 3  ;;  %s269_s15 = scalar_lea.sflag (!%p1250_p8), [#allocation4], %s1318_s12 }
  0x46   : > { %s1324_s1 = scalar_lea.vmem (!%p1250_p8), [#allocation3], %s800_s10  ;;  %p1408_p12 = scmp.ne.s32.totalorder (!%p1250_p8), %s1401_s28, 0 }
  0x49   : > { %1122 = dma.done.wait (%p1408_p12), %s269_s15, 128  }
  0x4a   : > { %1124 = vsyncadd (%p1408_p12), %s269_s15, 4294967168  ;;  %p1409_p3 = scmp.ne.s32.totalorder %s1399_s26, 0 }
  0x4c   : > { %1126 = dma.done.wait (%p1409_p3), [#allocation7], 4096  }
  0x4d   : > { %1128 = vsyncadd (%p1409_p3), [#allocation7], 4294963200  ;;  %v1164_v0 = vmov 0   ;;  %v951_v1 = vld [vmem:[#allocation6 + $0x74] ss:$8 sps:$4 sm:$0xff]   ;;  %v979_v15 = vld [vmem:[#allocation8 + $0x68] sm:$0xff]   ;;  %v344_v35 = vlaneseq }
  0x4e   : > { %466 = vmatprep.mubr.bf16.mxu0 %v1164_v0  ;;  %v953_v2 = vld [vmem:[#allocation6 + $0x70] ss:$8 sps:$4 sm:$0xff]   ;;  %434 = vmatprep.subr.bf16.mxu0 %v951_v1  ;;  %v954_v3 = vld [vmem:[#allocation6 + $0x64] ss:$8 sps:$4 sm:$0xff]   ;;  %v956_v4 = vld [vmem:[#allocation6 + $0x60] ss:$8 sps:$4 sm:$0xff]  }
  0x4f   : > { %435 = vmatpush1.bf16.msra.mxu0 %v953_v2  ;;  %v957_v5 = vld [vmem:[#allocation6 + $0x54] ss:$8 sps:$4 sm:$0xff]   ;;  %v959_v6 = vld [vmem:[#allocation6 + $0x50] ss:$8 sps:$4 sm:$0xff]   ;;  %v960_v7 = vld [vmem:[#allocation6 + $0x44] ss:$8 sps:$4 sm:$0xff]  }
  0x50   : > { %436 = vmatprep.subr.bf16.mxu0 %v954_v3  ;;  %v962_v8 = vld [vmem:[#allocation6 + $0x40] ss:$8 sps:$4 sm:$0xff]   ;;  %v963_v9 = vld [vmem:[#allocation6 + $0x34] ss:$8 sps:$4 sm:$0xff]   ;;  %v965_v12 = vld [vmem:[#allocation6 + $0x30] ss:$8 sps:$4 sm:$0xff]  }
  0x51   : > { %v975_v10 = vld [vmem:[#allocation8 + $0x78] sm:$0xff]   ;;  %v977_v13 = vld [vmem:[#allocation8 + $0x70] sm:$0xff]   ;;  %v966_v16 = vld [vmem:[#allocation6 + $0x24] ss:$8 sps:$4 sm:$0xff]   ;;  %v345_v36 = vshrl.u32 %v344_v35, 7  ;;  %s838_s17 = sshll.u32 %s1147_s21, 7 }
  0x52   : > { %v976_v11 = vld [vmem:[#allocation8 + $0x38] sm:$0xff]   ;;  %841 = vmatprep.subr.bf16.mxu1 %v975_v10  ;;  %v978_v14 = vld [vmem:[#allocation8 + $0x30] sm:$0xff]   ;;  %v968_v17 = vld [vmem:[#allocation6 + $0x20] ss:$8 sps:$4 sm:$0xff]   ;;  %s310_s24 = scalar_lea.vmem [#allocation9], %s800_s10  ;;  %s1347_s8 = scalar_lea.hbm %s1394_s5, %s838_s17 }
  0x53   : > { %437 = vmatpush1.bf16.msra.mxu0 %v956_v4  ;;  %842 = vmatpush3.bf16.msra.mxu1 %v976_v11  ;;  %v980_v18 = vld [vmem:[#allocation8 + $0x28] sm:$0xff]   ;;  %v981_v19 = vld [vmem:[#allocation8 + $0x60] sm:$0xff]   ;;  %v969_v20 = vld [vmem:[#allocation6 + $0x14] ss:$8 sps:$4 sm:$0xff]   ;;  %v346_v37 = vsub.s32 0, %v345_v36  ;;  %v350_v39 = vsub.s32 1, %v345_v36 }
  0x54   : > { %438 = vmatprep.subr.bf16.mxu0 %v957_v5  ;;  %843 = vmatprep.subr.bf16.mxu1 %v977_v13  ;;  %v971_v21 = vld [vmem:[#allocation6 + $0x10] ss:$8 sps:$4 sm:$0xff]   ;;  %v972_v22 = vld [vmem:[#allocation6 + $0x4] ss:$8 sps:$4 sm:$0xff]   ;;  %v974_v26 = vld [vmem:[#allocation6] ss:$8 sps:$4 sm:$0xff]  }
  0x55   : > { %v982_v23 = vld [vmem:[#allocation8 + $0x20] sm:$0xff]   ;;  %v983_v24 = vld [vmem:[#allocation8 + $0x58] sm:$0xff]   ;;  %v985_v28 = vld [vmem:[#allocation8 + $0x50] sm:$0xff]   ;;  %s677_s25 = sshll.u32 %s310_s24, 4  ;;  %s664_s9 = scalar_lea.sflag [#allocation5], %s1318_s12  ;;  %s678_s25 = int_to_ptr.vmem [resolvable:$true] %s677_s25 }
  0x56   : > { %v984_v25 = vld [vmem:[#allocation8 + $0x18] sm:$0xff]   ;;  %v986_v30 = vld [vmem:[#allocation8 + $0x10] sm:$0xff]   ;;  %v987_v31 = vld [vmem:[#allocation8 + $0x48] sm:$0xff]   ;;  %s1071_s13 = scalar_lea.vmem %s678_s25, 128  ;;  %s1165_s21 = smov [#allocation9]  }
  0x57   : > { %439 = vmatpush1.bf16.msra.mxu0 %v959_v6  ;;  %844 = vmatpush3.bf16.msra.mxu1 %v978_v14  ;;  %v324_v27 = vld [vmem:[%s1324_s1] sm:$0xff]  ;;  %v988_v32 = vld [vmem:[#allocation8 + $0x8] sm:$0xff]   ;;  %v989_v33 = vld [vmem:[#allocation8 + $0x40] sm:$0xff]   ;;  %p1072_p8 = scmp.ne.s32.totalorder %s678_s25, %s1071_s13  ;;  %s1075_s10 = sshll.u32 %s1165_s21, 4  ;;  %s1076_s10 = int_to_ptr.vmem [resolvable:$false] %s1075_s10 }
  0x58   : > { %440 = vmatprep.subr.bf16.mxu0 %v960_v7  ;;  %845 = vmatprep.subr.bf16.mxu1 %v979_v15  ;;  %v325_v29 = vpack.c.bf16 %v324_v27, %v324_v27  ;;  %v990_v34 = vld [vmem:[#allocation8] sm:$0xff]   ;;  %v342_v38 = vld [vmem:[%s1391_s2] sm:$0x3]  ;;  %s1077_s15 = scalar_lea.vmem %s1076_s10, 256  ;;  %p1078_p2 = scmp.lt.s32.totalorder %s678_s25, %s1076_s10 }
  0x59   : > { %v347_v40 = vrot.slane %v342_v38, %v346_v37  ;;  %v351_v41 = vrot.slane %v342_v38, %v350_v39  ;;  %v836_v54 = vld [vmem:[%s1393_s4] ss:$0 sm:$0xff]  ;;  %p1073_p9 = pnand %p1072_p8, %p1291_p7  ;;  %p1079_p13 = scmp.lt.s32.totalorder %s1077_s15, %s1071_s13 }
  0x5b   : > { %441 = vmatpush1.bf16.msra.mxu0 %v962_v8  ;;  %846 = vmatpush3.bf16.msra.mxu1 %v980_v18  ;;  %p1074_p11 = pneg %p1073_p9  ;;  %p1080_p0 = por %p1079_p13, %p1078_p2 }
  0x5c   : > { %442 = vmatprep.subr.bf16.mxu0 %v963_v9  ;;  %847 = vmatprep.subr.bf16.mxu1 %v981_v19 }
  0x5d   : > { %p1081_p5 = pnand %p1080_p0, %p1074_p11 }
  0x5f   : > { %443 = vmatpush1.bf16.msra.mxu0 %v965_v12  ;;  %848 = vmatpush3.bf16.msra.mxu1 %v982_v23 }
  0x60   : > { %444 = vmatprep.subr.bf16.mxu0 %v966_v16  ;;  %849 = vmatprep.subr.bf16.mxu1 %v983_v24 }
  0x63   : > { %445 = vmatpush1.bf16.msra.mxu0 %v968_v17  ;;  %850 = vmatpush3.bf16.msra.mxu1 %v984_v25 }
  0x64   : > { %446 = vmatprep.subr.bf16.mxu0 %v969_v20  ;;  %851 = vmatprep.subr.bf16.mxu1 %v985_v28 }
  0x67   : > { %447 = vmatpush1.bf16.msra.mxu0 %v971_v21  ;;  %852 = vmatpush3.bf16.msra.mxu1 %v986_v30 }
  0x68   : > { %448 = vmatprep.subr.bf16.mxu0 %v972_v22  ;;  %853 = vmatprep.subr.bf16.mxu1 %v987_v31 }
  0x6b   : > { %449 = vmatpush1.bf16.msra.mxu0 %v974_v26  ;;  %854 = vmatpush3.bf16.msra.mxu1 %v988_v32 }
  0x6c   : > { %855 = vmatprep.subr.bf16.mxu1 %v989_v33 }
  0x6e   : > { %467 = vmatmul.mubr.bf16.vlgmr.msra.gmra.mxu0 %v325_v29 }
  0x6f   : > { %856 = vmatpush3.bf16.msra.mxu1 %v990_v34 }
 0x12e   : > { %v468_v42 = vpop.f32.mrf.mxu0 }
 0x12f   : > { %v469_v43 = vadd.f32 %v468_v42, %v347_v40 }
 0x130   : > { %v470_v44 = vpop.f32.mrf.mxu0 }
 0x131   : > { %v471_v45 = vadd.f32 %v470_v44, %v351_v41  ;;  %v475_v46 = vmax.f32 %v469_v43, 0.0 }
 0x132   : > { %v472_v47 = vpop.f32.mrf.mxu0 }
 0x133   : > { %v476_v48 = vmax.f32 %v471_v45, 0.0  ;;  %v478_v51 = vpack.c.bf16 %v475_v46, %v475_v46 }
 0x134   : > { %v473_v49 = vpop.f32.mrf.mxu0 }
 0x135   : > { %v479_v50 = vpack.c.bf16 %v476_v48, %v476_v48 }
 0x137   : > { %640 = vmatprep.mubr.bf16.mxu1 %v479_v50 }
 0x138   : > { %641 = vmatmul.mubr.bf16.vlgmr.msra.gmra.mxu1 %v478_v51 }
 0x1f8   : > { %v857_v52 = vpop.f32.mrf.mxu1 }
 0x1fa   : > { %v858_v53 = vpop.f32.mrf.mxu1 }
 0x1fb   : > { %v859_v55 = vadd.f32 %v858_v53, %v857_v52 }
 0x1fc   : > { %v860_v56 = vpop.f32.mrf.mxu1 }
 0x1fd   : > { %v661_v57 = vadd.f32 %v859_v55, %v836_v54 }
 0x1fe   : > { %v861_v58 = vpop.f32.mrf.mxu1 }
 0x1ff   : > { %662 = vst [vmem:[%s310_s24] sm:$0xff] %v661_v57 }
 0x200   : > { %1084 = shalt.err (!%p1081_p5)
}
 0x201   : > { %s1085_s1 = scalar_lea.hbm %s1347_s8, 128  ;;  %s1089_s28 = scalar_lea.hbm %s1394_s5, 256 }
 0x202   : > { %p1086_p10 = scmp.ne.s32.totalorder %s1347_s8, %s1085_s1  ;;  %p1090_p6 = scmp.lt.s32.totalorder %s1347_s8, %s1394_s5 }
 0x203   : > { %p1091_p12 = scmp.lt.s32.totalorder %s1089_s28, %s1085_s1 }
 0x204   : > { %p1087_p1 = pnand %p1086_p10, %p1291_p7 }
 0x205   : > { %p1092_p3 = por %p1091_p12, %p1090_p6 }
 0x206   : > { %p1088_p4 = pneg %p1087_p1 }
 0x208   : > { %p1093_p8 = pnand %p1092_p3, %p1088_p4 }
 0x20a   : > { %1096 = shalt.err (!%p1093_p8)
}
 0x20b   : > { %873 = dma.vmem_to_hbm [thread:$0]  (%p1291_p7), %s678_s25, 128, %s1347_s8, %s664_s9  }
 0x20c PF: > { %s689_s17 = sand.u32 1, %s1135_s18   ;;  %p1410_p9 = scmp.ne.s32.totalorder %s1402_s29, 0 }
 0x20d   : > { %p1411_p11 = scmp.ge.s32.totalorder %s1155_s23, 2  ;;  %s690_s24 = scalar_lea.sflag [#allocation5], %s689_s17 }
 0x20f   : > { %p887_p2 = pnand %p1411_p11, %p1410_p9 }
 0x211   : > { %p888_p13 = pneg %p887_p2 }
 0x213   : > { %1130 = dma.done.wait (%p888_p13), %s690_s24, 128  }
 0x214   : > { %1132 = vsyncadd (%p888_p13), %s690_s24, 4294967168  ;;  %s22_s23 = sadd.s32 1, %s1155_s23   ;;  %s1412_s18 = smov %s1139_s19 }
 0x215   : > { %p19_p0 = scmp.ge.s32.totalorder %s22_s23, 4   ;;  %s1413_s19 = smov %s1143_s20 }
 0x216   : > { %s1414_s20 = smov %s1300_s14  ;;  %s1415_s21 = smov %s1151_s22 }
 0x217   : > { %s1416_s22 = smov %s1418_s7  ;;  %21 = sbr.rel (!%p19_p0) target bundleno = 9 (0x9), region = 106 }
 0x21c   :  { %695 = vsyncpa [#allocation4], 1 }
 0x21d   :  { %697 = vsyncpa [#allocation4 + $0x1], 1 }
 0x21e   :  { %698 = vsyncpa [#allocation7], 1 }
 0x21f   :  { %699 = vsyncpa [#allocation5], 1 }
 0x220   :  { %701 = vsyncpa [#allocation5 + $0x1], 1 }

// kernel: tpu_custom_call.1
= control target key start
LH: loop header
LB: loop body
LE: loop exit
PB: predicated region body
PF: predicated region fallthrough
CT: control target
= control target key end

     0   :  { %s1389_s0 = inlined_call_operand.hbm [shape: f32[16,128], index: 0, kind: input, shape index: {}]   ;;  %s1390_s1 = inlined_call_operand.hbm [shape: bf16[128,256], index: 1, kind: input, shape index: {}]   ;;  %s1391_s2 = inlined_call_operand.vmem [shape: f32[1,256], index: 2, kind: input, shape index: {}]   ;;  %s1392_s3 = inlined_call_operand.hbm [shape: bf16[256,128], index: 3, kind: input, shape index: {}]   ;;  %s1393_s4 = inlined_call_operand.vmem [shape: f32[1,128], index: 4, kind: input, shape index: {}]   ;;  %s1394_s5 = inlined_call_operand.hbm [shape: f32[16,128], index: 5, kind: output, shape index: {}]  }
   0x1   :  { %1398 = sst [smem:[#allocation13_spill]] %s1390_s1 }
   0x2   :  { %10 = vsyncpa [#allocation4], 0 }
   0x3   :  { %12 = vsyncpa [#allocation4 + $0x1], 0 }
   0x4   :  { %13 = vsyncpa [#allocation7], 0 }
   0x5   :  { %14 = vsyncpa [#allocation5], 0 }
   0x6   :  { %16 = vsyncpa [#allocation5 + $0x1], 0  ;;  %s1196_s18 = smov 0   ;;  %s1198_s19 = smov 0  }
   0x7   :  { %s1200_s20 = smov 0   ;;  %s1202_s21 = smov 0  }
   0x8   :  { %s1204_s22 = smov 0   ;;  %s1206_s23 = smov 0  }
   0x9 LB: > { %s790_s24 = sadd.s32 4294967295, %s1155_s23   ;;  %s791_s25 = sadd.s32 4294967294, %s1155_s23   ;;  %s1155_s23 = sphi %s1206_s23, %s22_s23   ;;  %s1151_s22 = sphi %s1204_s22, %s1416_s22   ;;  %s1147_s21 = sphi %s1202_s21, %s1415_s21   ;;  %s1143_s20 = sphi %s1200_s20, %s1414_s20   ;;  %s1139_s19 = sphi %s1198_s19, %s1413_s19   ;;  %s1135_s18 = sphi %s1196_s18, %s1412_s18  }
   0xa   : > { %p54_p0 = scmp.ne.s32.totalorder %s1139_s19, %s1135_s18  ;;  %p1230_p1 = scmp.eq.s32.totalorder %s790_s24, 0 }
   0xb   : > { %p1234_p2 = scmp.eq.s32.totalorder %s790_s24, 1  ;;  %p183_p3 = scmp.eq.s32.totalorder %s791_s25, 1 }
   0xc   : > { %s1399_s26 = scalar_select %p1230_p1, 1, 0 }
   0xd   : > { %p1240_p4 = por %p1230_p1, %p54_p0  ;;  %p792_p5 = scmp.ge.s32.totalorder %s1155_s23, 1 }
   0xe   : > { %p1245_p6 = por %p183_p3, %p54_p0  ;;  %p190_p7 = scmp.lt.s32.totalorder %s1155_s23, 3 }
   0xf   : > { %s1401_s28 = scalar_select %p1240_p4, 1, 0 }
  0x10   : > { %s1402_s29 = scalar_select %p1245_p6, 1, 0 }
  0x11   : > { %p1250_p8 = pnand %p792_p5, %p190_p7  ;;  %s1157_s6 = smov [#allocation6]  }
  0x12   : > { %s205_s7 = sshll.u32 %s1157_s6, 4  ;;  %s1158_s9 = smov [#allocation8]   ;;  %s206_s7 = int_to_ptr.vmem [resolvable:$true] %s205_s7 }
  0x13   : > { %p875_p9 = pneg %p1250_p8  ;;  %s229_s10 = sshll.u32 %s1158_s9, 4  ;;  %s230_s10 = int_to_ptr.vmem [resolvable:$true] %s229_s10 }
  0x14   : > { %s1002_s11 = scalar_lea.vmem %s206_s7, 2048  ;;  %p1010_p5 = scmp.lt.s32.totalorder %s206_s7, %s206_s7 }
  0x15   : > { %p1259_p11 = pnand %p875_p9, %p1230_p1  ;;  %p1003_p13 = scmp.ne.s32.totalorder %s206_s7, %s1002_s11 }
  0x16   : > { %p1011_p7 = scmp.lt.s32.totalorder %s1002_s11, %s1002_s11 }
  0x17   : > { %p993_p12 = pneg %p1259_p11 }
  0x18   : > { %p1012_p10 = por %p1011_p7, %p1010_p5 }
  0x19   : > { %p1005_p0 = pnand %p1003_p13, %p993_p12 }
  0x1b   : > { %p1006_p3 = pneg %p1005_p0 }
  0x1d   : > { %p1013_p9 = pnand %p1012_p10, %p1006_p3 }
  0x1f   : > { %1016 = shalt.err (!%p1013_p9)
}
  0x20   : > { %s1159_s12 = smov 128   ;;  %s1160_s13 = smov 8  }
  0x21   : > { %s1405_s1 = sld [smem:[#allocation13_spill]]  ;;  %s1028_s16 = scalar_lea.vmem %s230_s10, 2048 }
  0x22   : > { %p1029_p6 = scmp.ne.s32.totalorder %s230_s10, %s1028_s16  ;;  %p1036_p1 = scmp.lt.s32.totalorder %s230_s10, %s230_s10 }
  0x23   : > { %p1037_p4 = scmp.lt.s32.totalorder %s1028_s16, %s1028_s16 }
  0x24   : > { %p1031_p13 = pnand %p1029_p6, %p993_p12 }
  0x25   : > { %p1038_p5 = por %p1037_p4, %p1036_p1 }
  0x26   : > { %p1032_p0 = pneg %p1031_p13 }
  0x27   : > { %878 = dma.hbm_to_vmem [thread:$0]  (!%p1259_p11), %s1405_s1, 2048, %s206_s7, [#allocation7], %s1159_s12, %s1159_s12, %s1160_s13  }
  0x28   : > { %p1039_p10 = pnand %p1038_p5, %p1032_p0 }
  0x2a   : > { %1042 = shalt.err (!%p1039_p10)
}
  0x2b   : > { %s1161_s17 = smov 64   ;;  %s1162_s24 = smov 4  }
  0x2c   : > { %881 = dma.hbm_to_vmem [thread:$0]  (!%p1259_p11), %s1392_s3, 2048, %s230_s10, [#allocation7], %s1161_s17, %s1161_s17, %s1162_s24  }
  0x2d   : > { %s34_s7 = sadd.s32 1, %s1151_s22  ;;  %s41_s9 = sadd.s32 1, %s1143_s20 }
  0x2e   : > { %p36_p1 = scmp.ge.s32.totalorder %s34_s7, 2  ;;  %p48_p4 = scmp.ne.s32.totalorder %s1143_s20, %s1139_s19 }
  0x2f   : > { %p49_p6 = scmp.eq.s32.totalorder %s1155_s23, 0  ;;  %p892_p12 = scmp.lt.s32.totalorder %s1155_s23, 2 }
  0x30   : > { %s1418_s7 = smov (%p36_p1, %s34_s7), 0  ;;  %p1291_p7 = por %p1234_p2, %p48_p4 }
  0x31   : > { %p50_p3 = por %p49_p6, %p48_p4  ;;  %s38_s8 = ssub.s32 %s1151_s22, %s1418_s7 }
  0x32   : > { %s246_s12 = sand.u32 1, %s1143_s20   ;;  %p39_p9 = scmp.eq.s32.totalorder %s38_s8, 0 }
  0x33   : > { %s797_s10 = sshll.u32 %s246_s12, 3  ;;  %s798_s13 = sshll.u32 %s1151_s22, 7 }
  0x34   : > { %s1300_s14 = scalar_select %p39_p9, %s1143_s20, %s41_s9  }
  0x35   : > { %s255_s17 = scalar_lea.hbm %s1389_s0, %s798_s13  ;;  %s250_s24 = scalar_lea.vmem [#allocation3], %s797_s10 }
  0x36   : > { %s257_s25 = sshll.u32 %s250_s24, 4  ;;  %p1307_p11 = pnand %p892_p12, %p50_p3  ;;  %s258_s25 = int_to_ptr.vmem [resolvable:$true] %s257_s25 }
  0x37   : > { %s247_s6 = scalar_lea.sflag [#allocation4], %s246_s12  ;;  %s1056_s8 = scalar_lea.vmem %s258_s25, 128 }
  0x38   : > { %p1045_p2 = pneg %p1307_p11  ;;  %p1057_p13 = scmp.ne.s32.totalorder %s258_s25, %s1056_s8 }
  0x39   : > { %s1163_s9 = smov [#allocation3]  }
  0x3a   : > { %p1059_p0 = pnand %p1057_p13, %p1045_p2  ;;  %s1061_s1 = sshll.u32 %s1163_s9, 4  ;;  %s1062_s1 = int_to_ptr.vmem [resolvable:$false] %s1061_s1 }
  0x3b   : > { %s1063_s13 = scalar_lea.vmem %s1062_s1, 256  ;;  %p1064_p10 = scmp.lt.s32.totalorder %s258_s25, %s1062_s1 }
  0x3c   : > { %p1060_p5 = pneg %p1059_p0  ;;  %p1065_p1 = scmp.lt.s32.totalorder %s1063_s13, %s1056_s8 }
  0x3e   : > { %p1066_p4 = por %p1065_p1, %p1064_p10 }
  0x40   : > { %p1067_p6 = pnand %p1066_p4, %p1060_p5 }
  0x42   : > { %1070 = shalt.err (!%p1067_p6)
}
  0x43   : > { %885 = dma.hbm_to_vmem [thread:$0]  (!%p1307_p11), %s255_s17, 128, %s258_s25, %s247_s6  }
  0x44   : > { %266 = sbr.rel (%p1250_p8) target bundleno = 524 (0x20c), region = 40  ;;  %s1318_s12 = sand.u32 (!%p1250_p8), 1, %s1139_s19  }
  0x45   : > { %s800_s10 = sshll.u32 (!%p1250_p8), %s1318_s12, 3  ;;  %s269_s15 = scalar_lea.sflag (!%p1250_p8), [#allocation4], %s1318_s12 }
  0x46   : > { %s1324_s1 = scalar_lea.vmem (!%p1250_p8), [#allocation3], %s800_s10  ;;  %p1408_p12 = scmp.ne.s32.totalorder (!%p1250_p8), %s1401_s28, 0 }
  0x49   : > { %1122 = dma.done.wait (%p1408_p12), %s269_s15, 128  }
  0x4a   : > { %1124 = vsyncadd (%p1408_p12), %s269_s15, 4294967168  ;;  %p1409_p3 = scmp.ne.s32.totalorder %s1399_s26, 0 }
  0x4c   : > { %1126 = dma.done.wait (%p1409_p3), [#allocation7], 4096  }
  0x4d   : > { %1128 = vsyncadd (%p1409_p3), [#allocation7], 4294963200  ;;  %v1164_v0 = vmov 0   ;;  %v951_v1 = vld [vmem:[#allocation6 + $0x74] ss:$8 sps:$4 sm:$0xff]   ;;  %v979_v15 = vld [vmem:[#allocation8 + $0x68] sm:$0xff]   ;;  %v344_v35 = vlaneseq }
  0x4e   : > { %466 = vmatprep.mubr.bf16.mxu0 %v1164_v0  ;;  %v953_v2 = vld [vmem:[#allocation6 + $0x70] ss:$8 sps:$4 sm:$0xff]   ;;  %434 = vmatprep.subr.bf16.mxu0 %v951_v1  ;;  %v954_v3 = vld [vmem:[#allocation6 + $0x64] ss:$8 sps:$4 sm:$0xff]   ;;  %v956_v4 = vld [vmem:[#allocation6 + $0x60] ss:$8 sps:$4 sm:$0xff]  }
  0x4f   : > { %435 = vmatpush1.bf16.msra.mxu0 %v953_v2  ;;  %v957_v5 = vld [vmem:[#allocation6 + $0x54] ss:$8 sps:$4 sm:$0xff]   ;;  %v959_v6 = vld [vmem:[#allocation6 + $0x50] ss:$8 sps:$4 sm:$0xff]   ;;  %v960_v7 = vld [vmem:[#allocation6 + $0x44] ss:$8 sps:$4 sm:$0xff]  }
  0x50   : > { %436 = vmatprep.subr.bf16.mxu0 %v954_v3  ;;  %v962_v8 = vld [vmem:[#allocation6 + $0x40] ss:$8 sps:$4 sm:$0xff]   ;;  %v963_v9 = vld [vmem:[#allocation6 + $0x34] ss:$8 sps:$4 sm:$0xff]   ;;  %v965_v12 = vld [vmem:[#allocation6 + $0x30] ss:$8 sps:$4 sm:$0xff]  }
  0x51   : > { %v975_v10 = vld [vmem:[#allocation8 + $0x78] sm:$0xff]   ;;  %v977_v13 = vld [vmem:[#allocation8 + $0x70] sm:$0xff]   ;;  %v966_v16 = vld [vmem:[#allocation6 + $0x24] ss:$8 sps:$4 sm:$0xff]   ;;  %v345_v36 = vshrl.u32 %v344_v35, 7  ;;  %s838_s17 = sshll.u32 %s1147_s21, 7 }
  0x52   : > { %v976_v11 = vld [vmem:[#allocation8 + $0x38] sm:$0xff]   ;;  %841 = vmatprep.subr.bf16.mxu1 %v975_v10  ;;  %v978_v14 = vld [vmem:[#allocation8 + $0x30] sm:$0xff]   ;;  %v968_v17 = vld [vmem:[#allocation6 + $0x20] ss:$8 sps:$4 sm:$0xff]   ;;  %s310_s24 = scalar_lea.vmem [#allocation9], %s800_s10  ;;  %s1347_s8 = scalar_lea.hbm %s1394_s5, %s838_s17 }
  0x53   : > { %437 = vmatpush1.bf16.msra.mxu0 %v956_v4  ;;  %842 = vmatpush3.bf16.msra.mxu1 %v976_v11  ;;  %v980_v18 = vld [vmem:[#allocation8 + $0x28] sm:$0xff]   ;;  %v981_v19 = vld [vmem:[#allocation8 + $0x60] sm:$0xff]   ;;  %v969_v20 = vld [vmem:[#allocation6 + $0x14] ss:$8 sps:$4 sm:$0xff]   ;;  %v346_v37 = vsub.s32 0, %v345_v36  ;;  %v350_v39 = vsub.s32 1, %v345_v36 }
  0x54   : > { %438 = vmatprep.subr.bf16.mxu0 %v957_v5  ;;  %843 = vmatprep.subr.bf16.mxu1 %v977_v13  ;;  %v971_v21 = vld [vmem:[#allocation6 + $0x10] ss:$8 sps:$4 sm:$0xff]   ;;  %v972_v22 = vld [vmem:[#allocation6 + $0x4] ss:$8 sps:$4 sm:$0xff]   ;;  %v974_v26 = vld [vmem:[#allocation6] ss:$8 sps:$4 sm:$0xff]  }
  0x55   : > { %v982_v23 = vld [vmem:[#allocation8 + $0x20] sm:$0xff]   ;;  %v983_v24 = vld [vmem:[#allocation8 + $0x58] sm:$0xff]   ;;  %v985_v28 = vld [vmem:[#allocation8 + $0x50] sm:$0xff]   ;;  %s677_s25 = sshll.u32 %s310_s24, 4  ;;  %s664_s9 = scalar_lea.sflag [#allocation5], %s1318_s12  ;;  %s678_s25 = int_to_ptr.vmem [resolvable:$true] %s677_s25 }
  0x56   : > { %v984_v25 = vld [vmem:[#allocation8 + $0x18] sm:$0xff]   ;;  %v986_v30 = vld [vmem:[#allocation8 + $0x10] sm:$0xff]   ;;  %v987_v31 = vld [vmem:[#allocation8 + $0x48] sm:$0xff]   ;;  %s1071_s13 = scalar_lea.vmem %s678_s25, 128  ;;  %s1165_s21 = smov [#allocation9]  }
  0x57   : > { %439 = vmatpush1.bf16.msra.mxu0 %v959_v6  ;;  %844 = vmatpush3.bf16.msra.mxu1 %v978_v14  ;;  %v324_v27 = vld [vmem:[%s1324_s1] sm:$0xff]  ;;  %v988_v32 = vld [vmem:[#allocation8 + $0x8] sm:$0xff]   ;;  %v989_v33 = vld [vmem:[#allocation8 + $0x40] sm:$0xff]   ;;  %p1072_p8 = scmp.ne.s32.totalorder %s678_s25, %s1071_s13  ;;  %s1075_s10 = sshll.u32 %s1165_s21, 4  ;;  %s1076_s10 = int_to_ptr.vmem [resolvable:$false] %s1075_s10 }
  0x58   : > { %440 = vmatprep.subr.bf16.mxu0 %v960_v7  ;;  %845 = vmatprep.subr.bf16.mxu1 %v979_v15  ;;  %v325_v29 = vpack.c.bf16 %v324_v27, %v324_v27  ;;  %v990_v34 = vld [vmem:[#allocation8] sm:$0xff]   ;;  %v342_v38 = vld [vmem:[%s1391_s2] sm:$0x3]  ;;  %s1077_s15 = scalar_lea.vmem %s1076_s10, 256  ;;  %p1078_p2 = scmp.lt.s32.totalorder %s678_s25, %s1076_s10 }
  0x59   : > { %v347_v40 = vrot.slane %v342_v38, %v346_v37  ;;  %v351_v41 = vrot.slane %v342_v38, %v350_v39  ;;  %v836_v54 = vld [vmem:[%s1393_s4] ss:$0 sm:$0xff]  ;;  %p1073_p9 = pnand %p1072_p8, %p1291_p7  ;;  %p1079_p13 = scmp.lt.s32.totalorder %s1077_s15, %s1071_s13 }
  0x5b   : > { %441 = vmatpush1.bf16.msra.mxu0 %v962_v8  ;;  %846 = vmatpush3.bf16.msra.mxu1 %v980_v18  ;;  %p1074_p11 = pneg %p1073_p9  ;;  %p1080_p0 = por %p1079_p13, %p1078_p2 }
  0x5c   : > { %442 = vmatprep.subr.bf16.mxu0 %v963_v9  ;;  %847 = vmatprep.subr.bf16.mxu1 %v981_v19 }
  0x5d   : > { %p1081_p5 = pnand %p1080_p0, %p1074_p11 }
  0x5f   : > { %443 = vmatpush1.bf16.msra.mxu0 %v965_v12  ;;  %848 = vmatpush3.bf16.msra.mxu1 %v982_v23 }
  0x60   : > { %444 = vmatprep.subr.bf16.mxu0 %v966_v16  ;;  %849 = vmatprep.subr.bf16.mxu1 %v983_v24 }
  0x63   : > { %445 = vmatpush1.bf16.msra.mxu0 %v968_v17  ;;  %850 = vmatpush3.bf16.msra.mxu1 %v984_v25 }
  0x64   : > { %446 = vmatprep.subr.bf16.mxu0 %v969_v20  ;;  %851 = vmatprep.subr.bf16.mxu1 %v985_v28 }
  0x67   : > { %447 = vmatpush1.bf16.msra.mxu0 %v971_v21  ;;  %852 = vmatpush3.bf16.msra.mxu1 %v986_v30 }
  0x68   : > { %448 = vmatprep.subr.bf16.mxu0 %v972_v22  ;;  %853 = vmatprep.subr.bf16.mxu1 %v987_v31 }
  0x6b   : > { %449 = vmatpush1.bf16.msra.mxu0 %v974_v26  ;;  %854 = vmatpush3.bf16.msra.mxu1 %v988_v32 }
  0x6c   : > { %855 = vmatprep.subr.bf16.mxu1 %v989_v33 }
  0x6e   : > { %467 = vmatmul.mubr.bf16.vlgmr.msra.gmra.mxu0 %v325_v29 }
  0x6f   : > { %856 = vmatpush3.bf16.msra.mxu1 %v990_v34 }
 0x12e   : > { %v468_v42 = vpop.f32.mrf.mxu0 }
 0x12f   : > { %v469_v43 = vadd.f32 %v468_v42, %v347_v40 }
 0x130   : > { %v470_v44 = vpop.f32.mrf.mxu0 }
 0x131   : > { %v471_v45 = vadd.f32 %v470_v44, %v351_v41  ;;  %v475_v46 = vmax.f32 %v469_v43, 0.0 }
 0x132   : > { %v472_v47 = vpop.f32.mrf.mxu0 }
 0x133   : > { %v476_v48 = vmax.f32 %v471_v45, 0.0  ;;  %v478_v51 = vpack.c.bf16 %v475_v46, %v475_v46 }
 0x134   : > { %v473_v49 = vpop.f32.mrf.mxu0 }
 0x135   : > { %v479_v50 = vpack.c.bf16 %v476_v48, %v476_v48 }
 0x137   : > { %640 = vmatprep.mubr.bf16.mxu1 %v479_v50 }
 0x138   : > { %641 = vmatmul.mubr.bf16.vlgmr.msra.gmra.mxu1 %v478_v51 }
 0x1f8   : > { %v857_v52 = vpop.f32.mrf.mxu1 }
 0x1fa   : > { %v858_v53 = vpop.f32.mrf.mxu1 }
 0x1fb   : > { %v859_v55 = vadd.f32 %v858_v53, %v857_v52 }
 0x1fc   : > { %v860_v56 = vpop.f32.mrf.mxu1 }
 0x1fd   : > { %v661_v57 = vadd.f32 %v859_v55, %v836_v54 }
 0x1fe   : > { %v861_v58 = vpop.f32.mrf.mxu1 }
 0x1ff   : > { %662 = vst [vmem:[%s310_s24] sm:$0xff] %v661_v57 }
 0x200   : > { %1084 = shalt.err (!%p1081_p5)
}
 0x201   : > { %s1085_s1 = scalar_lea.hbm %s1347_s8, 128  ;;  %s1089_s28 = scalar_lea.hbm %s1394_s5, 256 }
 0x202   : > { %p1086_p10 = scmp.ne.s32.totalorder %s1347_s8, %s1085_s1  ;;  %p1090_p6 = scmp.lt.s32.totalorder %s1347_s8, %s1394_s5 }
 0x203   : > { %p1091_p12 = scmp.lt.s32.totalorder %s1089_s28, %s1085_s1 }
 0x204   : > { %p1087_p1 = pnand %p1086_p10, %p1291_p7 }
 0x205   : > { %p1092_p3 = por %p1091_p12, %p1090_p6 }
 0x206   : > { %p1088_p4 = pneg %p1087_p1 }
 0x208   : > { %p1093_p8 = pnand %p1092_p3, %p1088_p4 }
 0x20a   : > { %1096 = shalt.err (!%p1093_p8)
}
 0x20b   : > { %873 = dma.vmem_to_hbm [thread:$0]  (%p1291_p7), %s678_s25, 128, %s1347_s8, %s664_s9  }
 0x20c PF: > { %s689_s17 = sand.u32 1, %s1135_s18   ;;  %p1410_p9 = scmp.ne.s32.totalorder %s1402_s29, 0 }
 0x20d   : > { %p1411_p11 = scmp.ge.s32.totalorder %s1155_s23, 2  ;;  %s690_s24 = scalar_lea.sflag [#allocation5], %s689_s17 }
 0x20f   : > { %p887_p2 = pnand %p1411_p11, %p1410_p9 }
 0x211   : > { %p888_p13 = pneg %p887_p2 }
 0x213   : > { %1130 = dma.done.wait (%p888_p13), %s690_s24, 128  }
 0x214   : > { %1132 = vsyncadd (%p888_p13), %s690_s24, 4294967168  ;;  %s22_s23 = sadd.s32 1, %s1155_s23   ;;  %s1412_s18 = smov %s1139_s19 }
 0x215   : > { %p19_p0 = scmp.ge.s32.totalorder %s22_s23, 4   ;;  %s1413_s19 = smov %s1143_s20 }
 0x216   : > { %s1414_s20 = smov %s1300_s14  ;;  %s1415_s21 = smov %s1151_s22 }
 0x217   : > { %s1416_s22 = smov %s1418_s7  ;;  %21 = sbr.rel (!%p19_p0) target bundleno = 9 (0x9), region = 106 }
 0x21c   :  { %695 = vsyncpa [#allocation4], 1 }
 0x21d   :  { %697 = vsyncpa [#allocation4 + $0x1], 1 }
 0x21e   :  { %698 = vsyncpa [#allocation7], 1 }
 0x21f   :  { %699 = vsyncpa [#allocation5], 1 }
 0x220   :  { %701 = vsyncpa [#allocation5 + $0x1], 1 }

</bundles_post_ra>
